<compile_context>
chip_gen: v7x
topology: tpu7x:2x2x1
jax: 0.10.0
libtpu: 0.0.40
codegen_flags: <defaults>
</compile_context>

<pallas_src>
import functools

import jax
import jax.numpy as jnp
from jax.experimental import pallas as pl
from jax.experimental.pallas import tpu as pltpu

BN_EPS = 1e-5
L2_EPS = 1e-12  # torch.nn.functional.normalize default eps


def _round_up(v, m):
    return (v + m - 1) // m * m


# ---------------------------------------------------------------------------
# Kernel: x-tile -> (cast) -> matmul -> +b1 -> ReLU -> matmul(f32) -> +b2 ->
#         row-wise L2 normalize (rsqrt on the EUP) -> store.
# ---------------------------------------------------------------------------
def _embed_kernel(x_ref, w1_ref, b1_ref, w2_ref, b2_ref, out_ref, *, mm_dtype):
    # x_ref: (TB, D_in) f32   w1_ref: (D_in, H) mm_dtype   b1_ref: (1, H) f32
    # w2_ref: (H, D_pad) f32 (BN folded)   b2_ref: (1, D_pad) f32
    # out_ref: (TB, D_pad) f32
    x = x_ref[...].astype(mm_dtype)          # in-kernel cast; no-op for f32 path
    h = jnp.dot(x, w1_ref[...], preferred_element_type=jnp.float32)
    h = jnp.maximum(h + b1_ref[...], 0.0)    # bias + ReLU (VPU)
    # Second (small) matmul in f32 — BN scale/shift already folded into w2/b2.
    e = jnp.dot(h, w2_ref[...], preferred_element_type=jnp.float32)
    e = e + b2_ref[...]
    # L2 normalize rows: e / max(||e||, eps) == e * rsqrt(max(||e||^2, eps^2)).
    # Padded embedding columns are exactly zero, so they don't perturb the norm.
    norm2 = jnp.sum(e * e, axis=1, keepdims=True)
    inv = jax.lax.rsqrt(jnp.maximum(norm2, L2_EPS * L2_EPS))
    out_ref[...] = (e * inv).astype(out_ref.dtype)


# ---------------------------------------------------------------------------
# One-time weight preparation (do this at init / whenever params change).
# ---------------------------------------------------------------------------
def prepare_params(params, *, use_bf16=True):
    """Fold eval-mode BatchNorm into the second linear, transpose, pad, cast."""
    # bn(h) = (h - mean) * s + beta,  s = gamma * rsqrt(var + eps)
    # => bn(h) @ W2^T + b2 = h @ (s[:,None] * W2^T) + (t @ W2^T + b2), t = beta - mean*s
    s = params["bn_gamma"] * jax.lax.rsqrt(params["bn_var"] + BN_EPS)   # (H,)
    t = params["bn_beta"] - params["bn_mean"] * s                       # (H,)
    w1_t = params["w1"].T                                               # (D_in, H)
    w2_t = params["w2"].T                                               # (H, D_emb)
    w2_fold = (w2_t * s[:, None]).astype(jnp.float32)                   # keep f32
    b2_fold = (t @ w2_t + params["b2"]).astype(jnp.float32)             # (D_emb,)

    D_emb = w2_fold.shape[1]
    H = w2_fold.shape[0]
    D_pad = max(128, _round_up(D_emb, 128))      # lane-dense output; do NOT go to 256
    if D_pad != D_emb:
        w2_fold = jnp.pad(w2_fold, ((0, 0), (0, D_pad - D_emb)))
        b2_fold = jnp.pad(b2_fold, (0, D_pad - D_emb))

    mm_dtype = jnp.bfloat16 if use_bf16 else jnp.float32
    prepared = {
        "w1": jax.device_put(w1_t.astype(mm_dtype)),            # (D_in, H)
        "b1": jax.device_put(params["b1"].reshape(1, H).astype(jnp.float32)),
        "w2": jax.device_put(w2_fold),                           # (H, D_pad) f32
        "b2": jax.device_put(b2_fold.reshape(1, D_pad)),         # (1, D_pad) f32
        "d_emb": int(D_emb),
        "mm_dtype": mm_dtype,
    }
    return prepared


# ---------------------------------------------------------------------------
# Batch-tile heuristic: minimize padding, prefer 128-row multiples for large B,
# prefer an even multi-step grid only when tiles stay large (>= 256 rows).
# ---------------------------------------------------------------------------
def _choose_batch_tile(B, max_tile=1024):
    best = None
    for n in (1, 2, 4, 8):
        tile = max(8, _round_up(pl.cdiv(B, n), 8))
        if B >= 256:
            tile = _round_up(tile, 128)          # full MXU M-strips
        tile = min(tile, max_tile)
        b_pad = _round_up(B, tile)
        grid = b_pad // tile
        pad = b_pad - B
        even_multi = (grid >= 2 and grid % 2 == 0)
        key = (pad, 0 if (even_multi and tile >= 256) else 1, -tile)
        if best is None or key < best[0]:
            best = (key, tile, b_pad)
    return best[1], best[2]


# ---------------------------------------------------------------------------
# Forward wrapper.
# ---------------------------------------------------------------------------
def embedding_net_forward(x, prepared, *, batch_tile=None, slice_output=True):
    """x: [B, D_in] float32.  prepared: output of prepare_params()."""
    B, D_in = x.shape
    H = prepared["w1"].shape[1]
    D_pad = prepared["w2"].shape[1]
    D_emb = prepared["d_emb"]
    mm_dtype = prepared["mm_dtype"]

    if batch_tile is None:
        batch_tile, B_pad = _choose_batch_tile(B)
    else:
        batch_tile = max(8, (batch_tile // 8) * 8)
        B_pad = _round_up(B, batch_tile)

    x_in = x
    if B_pad != B:                                # minimal tail padding only
        x_in = jnp.pad(x, ((0, B_pad - B), (0, 0)))

    grid = (B_pad // batch_tile,)

    # Real pipelined VMEM footprint:
    #   2x x-tile (f32) + 1x each weight/bias (Buffered(1)) + 2x out tile
    #   + h (TB*H f32) + e (TB*D_pad f32) temporaries, plus scratch headroom.
    w1_bytes = 2 if mm_dtype == jnp.bfloat16 else 4
    footprint = (2 * batch_tile * D_in * 4
                 + D_in * H * w1_bytes + H * 4
                 + H * D_pad * 4 + D_pad * 4
                 + 2 * batch_tile * D_pad * 4
                 + batch_tile * H * 4
                 + batch_tile * D_pad * 4)
    vmem_limit = int(min(max(footprint + (8 << 20), 32 << 20), 48 << 20))

    def whole(shape):
        return pl.BlockSpec(shape, lambda i: tuple(0 for _ in shape),
                            pipeline_mode=pl.Buffered(1))   # grid-invariant: 1 buffer

    kernel = functools.partial(_embed_kernel, mm_dtype=mm_dtype)

    out_full = pl.pallas_call(
        kernel,
        out_shape=jax.ShapeDtypeStruct((B_pad, D_pad), jnp.float32),
        grid_spec=pltpu.PrefetchScalarGridSpec(
            num_scalar_prefetch=0,
            grid=grid,
            in_specs=[
                pl.BlockSpec((batch_tile, D_in), lambda i: (i, 0)),  # x tile (streamed)
                whole((D_in, H)),                                    # w1^T
                whole((1, H)),                                       # b1
                whole((H, D_pad)),                                   # w2^T (BN folded, f32)
                whole((1, D_pad)),                                   # b2   (BN folded, f32)
            ],
            out_specs=pl.BlockSpec((batch_tile, D_pad), lambda i: (i, 0)),
        ),
        compiler_params=pltpu.CompilerParams(
            dimension_semantics=("parallel",),
            vmem_limit_bytes=vmem_limit),
    )(x_in, prepared["w1"], prepared["b1"], prepared["w2"], prepared["b2"])

    if slice_output:
        return out_full[:B, :D_emb]
    return out_full          # (B_pad, D_pad); consumer may slice lazily


# ---------------------------------------------------------------------------
# Deterministic synthetic parameters + pure-JAX reference.
# ---------------------------------------------------------------------------
def init_params(key, input_dim, hidden_dim, embedding_dim):
    k1, k2, k3, k4, k5, k6, k7, k8 = jax.random.split(key, 8)
    lim1 = 1.0 / jnp.sqrt(input_dim)
    lim2 = 1.0 / jnp.sqrt(hidden_dim)
    return {
        "w1": jax.random.uniform(k1, (hidden_dim, input_dim), jnp.float32, -lim1, lim1),
        "b1": jax.random.uniform(k2, (hidden_dim,), jnp.float32, -lim1, lim1),
        "w2": jax.random.uniform(k3, (embedding_dim, hidden_dim), jnp.float32, -lim2, lim2),
        "b2": jax.random.uniform(k4, (embedding_dim,), jnp.float32, -lim2, lim2),
        # Non-trivial eval-mode BatchNorm1d parameters (affine + running stats).
        "bn_gamma": jax.random.uniform(k5, (hidden_dim,), jnp.float32, 0.5, 1.5),
        "bn_beta": 0.1 * jax.random.normal(k6, (hidden_dim,), jnp.float32),
        "bn_mean": 0.1 * jax.random.normal(k7, (hidden_dim,), jnp.float32),
        "bn_var": jax.random.uniform(k8, (hidden_dim,), jnp.float32, 0.5, 1.5),
    }


def reference_forward(x, p):
    h = x @ p["w1"].T + p["b1"]
    h = jnp.maximum(h, 0.0)
    h = (h - p["bn_mean"]) / jnp.sqrt(p["bn_var"] + BN_EPS) * p["bn_gamma"] + p["bn_beta"]
    e = h @ p["w2"].T + p["b2"]
    n = jnp.sqrt(jnp.sum(e * e, axis=1, keepdims=True))
    return e / jnp.maximum(n, L2_EPS)


if __name__ == "__main__":
    # Small shapes consistent with the module (scaled down from 2048/512/100).
    B, D_IN, H, D_EMB = 16, 256, 128, 64

    key = jax.random.PRNGKey(0)
    kx, kp = jax.random.split(key)
    x = jax.random.normal(kx, (B, D_IN), dtype=jnp.float32)
    params = init_params(kp, D_IN, H, D_EMB)

    ref = reference_forward(x, params)

    # f32 matmul path — tight tolerance check of the fused kernel + BN fold.
    prep_f32 = prepare_params(params, use_bf16=False)
    out_f32 = jax.block_until_ready(embedding_net_forward(x, prep_f32))
    assert out_f32.shape == (B, D_EMB)
    assert jnp.allclose(out_f32, ref, atol=1e-4, rtol=1e-4), "f32 mismatch vs reference"

    # bf16 matmul path (f32 accumulation, f32 folded w2) — default fast path.
    prep_bf16 = prepare_params(params, use_bf16=True)
    out_bf16 = jax.block_until_ready(embedding_net_forward(x, prep_bf16))
    assert out_bf16.shape == (B, D_EMB)
    assert jnp.allclose(out_bf16, ref, atol=2e-2, rtol=2e-2), "bf16 mismatch vs reference"

    print("KERNEL_OK")
</pallas_src>

<mosaic_0001>
module attributes {stable_mosaic.version = 11 : i64} {
  func.func @_embed_kernel(%arg0: i32, %arg1: memref<16x256xf32, #tpu.memory_space<vmem>>, %arg2: memref<256x128xf32, #tpu.memory_space<vmem>>, %arg3: memref<1x128xf32, #tpu.memory_space<vmem>>, %arg4: memref<128x128xf32, #tpu.memory_space<vmem>>, %arg5: memref<1x128xf32, #tpu.memory_space<vmem>>, %arg6: memref<16x128xf32, #tpu.memory_space<vmem>>) attributes {dimension_semantics = [#tpu.dimension_semantics<parallel>], iteration_bounds = array<i64: 1>, scalar_prefetch = 0 : i64, scratch_operands = 0 : i64, tpu.core_type = #tpu.core_type<tc>, window_params = [{transform_indices = @transform_0, window_bounds = array<i64: 16, 256>}, {pipeline_mode = #tpu.pipeline_mode<synchronous>, transform_indices = @transform_1, window_bounds = array<i64: 256, 128>}, {pipeline_mode = #tpu.pipeline_mode<synchronous>, transform_indices = @transform_2, window_bounds = array<i64: 1, 128>}, {pipeline_mode = #tpu.pipeline_mode<synchronous>, transform_indices = @transform_3, window_bounds = array<i64: 128, 128>}, {pipeline_mode = #tpu.pipeline_mode<synchronous>, transform_indices = @transform_4, window_bounds = array<i64: 1, 128>}, {transform_indices = @transform_5, window_bounds = array<i64: 16, 128>}]} {
    %c0 = arith.constant 0 : index
    %c0_0 = arith.constant 0 : index
    %0 = vector.load %arg1[%c0, %c0_0] : memref<16x256xf32, #tpu.memory_space<vmem>>, vector<16x256xf32>
    %c0_1 = arith.constant 0 : index
    %c0_2 = arith.constant 0 : index
    %1 = vector.load %arg2[%c0_1, %c0_2] : memref<256x128xf32, #tpu.memory_space<vmem>>, vector<256x128xf32>
    %cst = arith.constant dense<0.000000e+00> : vector<16x128xf32>
    %2 = tpu.matmul %0, %1, %cst {dimension_numbers = #tpu.dot_dimension_numbers<[1], [0], [0], [1], [0, 0, 1, 1], [], []>} : vector<16x256xf32>, vector<256x128xf32>, vector<16x128xf32> -> vector<16x128xf32>
    %c0_3 = arith.constant 0 : index
    %c0_4 = arith.constant 0 : index
    %3 = vector.load %arg3[%c0_3, %c0_4] : memref<1x128xf32, #tpu.memory_space<vmem>>, vector<1x128xf32>
    %4 = vector.broadcast %3 : vector<1x128xf32> to vector<16x128xf32>
    %5 = arith.addf %2, %4 : vector<16x128xf32>
    %cst_5 = arith.constant 0.000000e+00 : f32
    %6 = vector.broadcast %cst_5 : f32 to vector<16x128xf32>
    %7 = arith.maximumf %5, %6 : vector<16x128xf32>
    %c0_6 = arith.constant 0 : index
    %c0_7 = arith.constant 0 : index
    %8 = vector.load %arg4[%c0_6, %c0_7] : memref<128x128xf32, #tpu.memory_space<vmem>>, vector<128x128xf32>
    %cst_8 = arith.constant dense<0.000000e+00> : vector<16x128xf32>
    %9 = tpu.matmul %7, %8, %cst_8 {dimension_numbers = #tpu.dot_dimension_numbers<[1], [0], [0], [1], [0, 0, 1, 1], [], []>} : vector<16x128xf32>, vector<128x128xf32>, vector<16x128xf32> -> vector<16x128xf32>
    %c0_9 = arith.constant 0 : index
    %c0_10 = arith.constant 0 : index
    %10 = vector.load %arg5[%c0_9, %c0_10] : memref<1x128xf32, #tpu.memory_space<vmem>>, vector<1x128xf32>
    %11 = vector.broadcast %10 : vector<1x128xf32> to vector<16x128xf32>
    %12 = arith.addf %9, %11 : vector<16x128xf32>
    %13 = arith.mulf %12, %12 : vector<16x128xf32>
    %cst_11 = arith.constant dense<0.000000e+00> : vector<16xf32>
    %14 = vector.multi_reduction <add>, %13, %cst_11 [1] : vector<16x128xf32> to vector<16xf32>
    %15 = vector.shape_cast %14 : vector<16xf32> to vector<16x1xf32>
    %cst_12 = arith.constant 1.000000e-24 : f32
    %16 = vector.broadcast %cst_12 : f32 to vector<16x1xf32>
    %17 = arith.maximumf %15, %16 : vector<16x1xf32>
    %18 = math.rsqrt %17 : vector<16x1xf32>
    %19 = vector.broadcast %18 : vector<16x1xf32> to vector<16x128xf32>
    %20 = arith.mulf %12, %19 : vector<16x128xf32>
    %c0_13 = arith.constant 0 : index
    %c0_14 = arith.constant 0 : index
    %21 = vector.load %arg6[%c0_13, %c0_14] : memref<16x128xf32, #tpu.memory_space<vmem>>, vector<16x128xf32>
    tpu.vector_store %arg6[%c0_13, %c0_14], %20 {strides = array<i32>} : memref<16x128xf32, #tpu.memory_space<vmem>>, vector<16x128xf32>,
    return
  }
  func.func @transform_0(%arg0: i32) -> (i32, i32) {
    %c0_i32 = arith.constant 0 : i32
    %c0_i32_0 = arith.constant 0 : i32
    return %arg0, %c0_i32 : i32, i32
  }
  func.func @transform_1(%arg0: i32) -> (i32, i32) {
    %c0_i32 = arith.constant 0 : i32
    %c0_i32_0 = arith.constant 0 : i32
    %c0_i32_1 = arith.constant 0 : i32
    return %c0_i32, %c0_i32_0 : i32, i32
  }
  func.func @transform_2(%arg0: i32) -> (i32, i32) {
    %c0_i32 = arith.constant 0 : i32
    %c0_i32_0 = arith.constant 0 : i32
    %c0_i32_1 = arith.constant 0 : i32
    return %c0_i32, %c0_i32_0 : i32, i32
  }
  func.func @transform_3(%arg0: i32) -> (i32, i32) {
    %c0_i32 = arith.constant 0 : i32
    %c0_i32_0 = arith.constant 0 : i32
    %c0_i32_1 = arith.constant 0 : i32
    return %c0_i32, %c0_i32_0 : i32, i32
  }
  func.func @transform_4(%arg0: i32) -> (i32, i32) {
    %c0_i32 = arith.constant 0 : i32
    %c0_i32_0 = arith.constant 0 : i32
    %c0_i32_1 = arith.constant 0 : i32
    return %c0_i32, %c0_i32_0 : i32, i32
  }
  func.func @transform_5(%arg0: i32) -> (i32, i32) {
    %c0_i32 = arith.constant 0 : i32
    %c0_i32_0 = arith.constant 0 : i32
    return %arg0, %c0_i32 : i32, i32
  }
}

</mosaic_0001>

<bundles_post_ra>
// kernel: tpu_custom_call.1
= control target key start
LH: loop header
LB: loop body
LE: loop exit
PB: predicated region body
PF: predicated region fallthrough
CT: control target
= control target key end

     0   :  { %10 = vsyncpa [#allocation3], 0  ;;  %s676_s0 = inlined_call_operand.hbm [shape: f32[16,256], index: 0, kind: input, shape index: {}]   ;;  %s677_s1 = inlined_call_operand.hbm [shape: f32[256,128], index: 1, kind: input, shape index: {}]   ;;  %s678_s2 = inlined_call_operand.vmem [shape: f32[1,128], index: 2, kind: input, shape index: {}]   ;;  %s679_s3 = inlined_call_operand.hbm [shape: f32[128,128], index: 3, kind: input, shape index: {}]   ;;  %s680_s4 = inlined_call_operand.vmem [shape: f32[1,128], index: 4, kind: input, shape index: {}]   ;;  %s681_s5 = inlined_call_operand.hbm [shape: f32[16,128], index: 5, kind: output, shape index: {}]  }
   0x1   :  { %11 = vsyncpa [#allocation6], 0 }
   0x2   :  { %12 = vsyncpa [#allocation4], 0  ;;  %s575_s18 = smov [#allocation5]   ;;  %s481_s22 = scalar_lea.hbm %s677_s1, 4096 }
   0x3   :  { %s30_s19 = sshll.u32 %s575_s18, 4  ;;  %p482_p0 = scmp.ne.s32.totalorder %s677_s1, %s481_s22  ;;  %s31_s19 = int_to_ptr.vmem [resolvable:$true] %s30_s19 }
   0x4   :  { %p485_p1 = scmp.lt.u32.totalorder %s481_s22, %s677_s1 }
   0x6   :  { %p487_p2 = pnand %p485_p1, %p482_p0 }
   0x8   :  { %490 = shalt.err (!%p487_p2)
}
   0x9   :  { %s491_s27 = scalar_lea.vmem %s31_s19, 4096  ;;  %p496_p4 = scmp.lt.s32.totalorder %s31_s19, %s31_s19 }
   0xa   :  { %p492_p3 = scmp.ne.s32.totalorder %s31_s19, %s491_s27  ;;  %p497_p5 = scmp.lt.s32.totalorder %s491_s27, %s491_s27 }
   0xc   :  { %p498_p6 = por %p497_p5, %p496_p4 }
   0xe   :  { %p499_p7 = pnand %p498_p6, %p492_p3 }
  0x10   :  { %502 = shalt.err (!%p499_p7)
}
  0x11   :  { %s576_s28 = smov 128   ;;  %s577_s29 = smov 8  }
  0x12   :  { %36 = dma.hbm_to_vmem [thread:$0]  %s677_s1, 4096, %s31_s19, [#allocation6], %s576_s28, %s576_s28, %s577_s29  }
  0x13   :  { %s578_s7 = smov [#allocation2]   ;;  %s503_s11 = scalar_lea.hbm %s676_s0, 512 }
  0x14   :  { %s18_s8 = sshll.u32 %s578_s7, 4  ;;  %p504_p8 = scmp.ne.s32.totalorder %s676_s0, %s503_s11  ;;  %s19_s8 = int_to_ptr.vmem [resolvable:$true] %s18_s8 }
  0x15   :  { %p507_p9 = scmp.lt.u32.totalorder %s503_s11, %s676_s0 }
  0x17   :  { %p509_p10 = pnand %p507_p9, %p504_p8 }
  0x19   :  { %512 = shalt.err (!%p509_p10)
}
  0x1a   :  { %s513_s16 = scalar_lea.vmem %s19_s8, 512  ;;  %p518_p12 = scmp.lt.s32.totalorder %s19_s8, %s19_s8 }
  0x1b   :  { %p514_p11 = scmp.ne.s32.totalorder %s19_s8, %s513_s16  ;;  %p519_p13 = scmp.lt.s32.totalorder %s513_s16, %s513_s16 }
  0x1d   :  { %p520_p0 = por %p519_p13, %p518_p12 }
  0x1f   :  { %p521_p1 = pnand %p520_p0, %p514_p11 }
  0x21   :  { %524 = shalt.err (!%p521_p1)
}
  0x22   :  { %s579_s1 = smov 256   ;;  %s580_s17 = smov 16  }
  0x23   :  { %24 = dma.hbm_to_vmem [thread:$0]  %s676_s0, 512, %s19_s8, [#allocation3], %s579_s1, %s579_s1, %s580_s17  }
  0x24   :  { %s581_s20 = smov [#allocation7]   ;;  %s525_s24 = scalar_lea.hbm %s679_s3, 2048 }
  0x25   :  { %s44_s21 = sshll.u32 %s581_s20, 4  ;;  %p526_p2 = scmp.ne.s32.totalorder %s679_s3, %s525_s24  ;;  %s45_s21 = int_to_ptr.vmem [resolvable:$true] %s44_s21 }
  0x26   :  { %p529_p3 = scmp.lt.u32.totalorder %s525_s24, %s679_s3 }
  0x28   :  { %p531_p4 = pnand %p529_p3, %p526_p2 }
  0x2a   :  { %534 = shalt.err (!%p531_p4)
}
  0x2b   :  { %s535_s6 = scalar_lea.vmem %s45_s21, 2048  ;;  %p540_p6 = scmp.lt.s32.totalorder %s45_s21, %s45_s21 }
  0x2c   :  { %p536_p5 = scmp.ne.s32.totalorder %s45_s21, %s535_s6  ;;  %p541_p7 = scmp.lt.s32.totalorder %s535_s6, %s535_s6 }
  0x2e   :  { %p542_p8 = por %p541_p7, %p540_p6 }
  0x30   :  { %p543_p9 = pnand %p542_p8, %p536_p5 }
  0x32   :  { %546 = shalt.err (!%p543_p9)
}
  0x33   :  { %50 = dma.hbm_to_vmem [thread:$0]  %s679_s3, 2048, %s45_s21, [#allocation6], %s576_s28, %s576_s28, %s577_s29  }
  0x34   :  { %569 = dma.done.wait [#allocation3], 512  }
  0x35   :  { %570 = vsyncadd [#allocation3], 4294966784 }
  0x36   :  { %571 = dma.done.wait [#allocation6], 6144  }
  0x37   :  { %572 = vsyncadd [#allocation6], 4294961152  ;;  %v82_v0 = vld [vmem:[#allocation5 + $0x80] sm:$0xff]  ;;  %v83_v1 = vld [vmem:[#allocation5 + $0x88] sm:$0xff] }
  0x38   :  { %v66_v2 = vld [vmem:[#allocation5] sm:$0xff]  ;;  %v405_v3 = vpack.c.bf16 %v83_v1, %v82_v0  ;;  %v67_v4 = vld [vmem:[#allocation5 + $0x8] sm:$0xff]  ;;  %v84_v5 = vld [vmem:[#allocation5 + $0x90] sm:$0xff] }
  0x39   :  { %v85_v6 = vld [vmem:[#allocation5 + $0x98] sm:$0xff]  ;;  %v407_v7 = vpack.c.bf16 %v67_v4, %v66_v2  ;;  %v68_v9 = vld [vmem:[#allocation5 + $0x10] sm:$0xff]  ;;  %v86_v11 = vld [vmem:[#allocation5 + $0xa0] sm:$0xff] }
  0x3a   :  { %v409_v8 = vpack.c.bf16 %v85_v6, %v84_v5  ;;  %v69_v10 = vld [vmem:[#allocation5 + $0x18] sm:$0xff]  ;;  %406 = vmatprep.subr.bf16.mxu0 %v405_v3  ;;  %v87_v12 = vld [vmem:[#allocation5 + $0xa8] sm:$0xff]  ;;  %v70_v15 = vld [vmem:[#allocation5 + $0x20] sm:$0xff] }
  0x3b   :  { %408 = vmatpush3.bf16.msra.mxu0 %v407_v7  ;;  %v411_v13 = vpack.c.bf16 %v69_v10, %v68_v9  ;;  %v413_v14 = vpack.c.bf16 %v87_v12, %v86_v11  ;;  %v71_v16 = vld [vmem:[#allocation5 + $0x28] sm:$0xff]  ;;  %v88_v17 = vld [vmem:[#allocation5 + $0xb0] sm:$0xff]  ;;  %v89_v18 = vld [vmem:[#allocation5 + $0xb8] sm:$0xff] }
  0x3c   :  { %410 = vmatprep.subr.bf16.mxu0 %v409_v8  ;;  %v415_v19 = vpack.c.bf16 %v71_v16, %v70_v15  ;;  %v417_v20 = vpack.c.bf16 %v89_v18, %v88_v17  ;;  %v72_v21 = vld [vmem:[#allocation5 + $0x30] sm:$0xff]  ;;  %v73_v22 = vld [vmem:[#allocation5 + $0x38] sm:$0xff]  ;;  %v90_v23 = vld [vmem:[#allocation5 + $0xc0] sm:$0xff] }
  0x3d   :  { %v91_v24 = vld [vmem:[#allocation5 + $0xc8] sm:$0xff]  ;;  %v74_v26 = vld [vmem:[#allocation5 + $0x40] sm:$0xff]  ;;  %v419_v27 = vpack.c.bf16 %v73_v22, %v72_v21  ;;  %v184_v30 = vld [vmem:[#allocation7 + $0x10] sm:$0xff] }
  0x3e   :  { %v63_v25 = vld [vmem:[#allocation2 + $0x8] sm:$0xff]  ;;  %v182_v28 = vld [vmem:[#allocation7] sm:$0xff]  ;;  %v421_v31 = vpack.c.bf16 %v91_v24, %v90_v23  ;;  %v92_v33 = vld [vmem:[#allocation5 + $0xd0] sm:$0xff] }
  0x3f   :  { %412 = vmatpush3.bf16.msra.mxu0 %v411_v13  ;;  %169 = vmatprep.mubr.f32.mxu0 %v63_v25  ;;  %v183_v29 = vld [vmem:[#allocation7 + $0x8] sm:$0xff]  ;;  %v185_v35 = vld [vmem:[#allocation7 + $0x18] sm:$0xff]  ;;  %v186_v38 = vld [vmem:[#allocation7 + $0x20] sm:$0xff] }
  0x40   :  { %414 = vmatprep.subr.bf16.mxu0 %v413_v14  ;;  %v75_v32 = vld [vmem:[#allocation5 + $0x48] sm:$0xff]  ;;  %v437_v34 = vpack.c.bf16 %v183_v29, %v182_v28  ;;  %v93_v36 = vld [vmem:[#allocation5 + $0xd8] sm:$0xff]  ;;  %v441_v37 = vpack.c.bf16 %v185_v35, %v184_v30  ;;  %v76_v42 = vld [vmem:[#allocation5 + $0x50] sm:$0xff] }
  0x41   :  { %v187_v39 = vld [vmem:[#allocation7 + $0x28] sm:$0xff]  ;;  %v423_v40 = vpack.c.bf16 %v75_v32, %v74_v26  ;;  %v425_v41 = vpack.c.bf16 %v93_v36, %v92_v33  ;;  %v77_v43 = vld [vmem:[#allocation5 + $0x58] sm:$0xff]  ;;  %v94_v44 = vld [vmem:[#allocation5 + $0xe0] sm:$0xff] }
  0x42   :  { %438 = vmatprep.subr.bf16.mxu1 %v437_v34  ;;  %v445_v45 = vpack.c.bf16 %v187_v39, %v186_v38  ;;  %v95_v46 = vld [vmem:[#allocation5 + $0xe8] sm:$0xff]  ;;  %v188_v47 = vld [vmem:[#allocation7 + $0x30] sm:$0xff]  ;;  %v189_v48 = vld [vmem:[#allocation7 + $0x38] sm:$0xff]  ;;  %v427_v49 = vpack.c.bf16 %v77_v43, %v76_v42 }
  0x43   :  { %416 = vmatpush3.bf16.msra.mxu0 %v415_v19  ;;  %440 = vmatpush3.bf16.msra.mxu1 %v437_v34  ;;  %v429_v50 = vpack.c.bf16 %v95_v46, %v94_v44  ;;  %v78_v51 = vld [vmem:[#allocation5 + $0x60] sm:$0xff]  ;;  %v79_v52 = vld [vmem:[#allocation5 + $0x68] sm:$0xff]  ;;  %v96_v53 = vld [vmem:[#allocation5 + $0xf0] sm:$0xff]  ;;  %v449_v54 = vpack.c.bf16 %v189_v48, %v188_v47 }
  0x44   :  { %418 = vmatprep.subr.bf16.mxu0 %v417_v20  ;;  %442 = vmatprep.subr.bf16.mxu1 %v441_v37  ;;  %v97_v55 = vld [vmem:[#allocation5 + $0xf8] sm:$0xff]  ;;  %v190_v56 = vld [vmem:[#allocation7 + $0x40] sm:$0xff]  ;;  %v191_v57 = vld [vmem:[#allocation7 + $0x48] sm:$0xff]  ;;  %v431_v58 = vpack.c.bf16 %v79_v52, %v78_v51 }
  0x45   :  { %v433_v59 = vpack.c.bf16 %v97_v55, %v96_v53  ;;  %v80_v60 = vld [vmem:[#allocation5 + $0x70] sm:$0xff]  ;;  %v81_v61 = vld [vmem:[#allocation5 + $0x78] sm:$0xff]  ;;  %v453_v62 = vpack.c.bf16 %v191_v57, %v190_v56  ;;  %v62_v0 = vld [vmem:[#allocation2] sm:$0xff] }
  0x46   :  { %v435_v63 = vpack.c.bf16 %v81_v61, %v80_v60  ;;  %v65_v1 = vld [vmem:[#allocation2 + $0x18] sm:$0xff]  ;;  %v64_v2 = vld [vmem:[#allocation2 + $0x10] sm:$0xff]  ;;  %v194_v6 = vld [vmem:[#allocation7 + $0x60] sm:$0xff] }
  0x47   :  { %420 = vmatpush3.bf16.msra.mxu0 %v419_v27  ;;  %444 = vmatpush3.bf16.msra.mxu1 %v441_v37  ;;  %v192_v3 = vld [vmem:[#allocation7 + $0x50] sm:$0xff]  ;;  %v193_v4 = vld [vmem:[#allocation7 + $0x58] sm:$0xff]  ;;  %v195_v7 = vld [vmem:[#allocation7 + $0x68] sm:$0xff] }
  0x48   :  { %422 = vmatprep.subr.bf16.mxu0 %v421_v31  ;;  %446 = vmatprep.subr.bf16.mxu1 %v445_v45  ;;  %v457_v5 = vpack.c.bf16 %v193_v4, %v192_v3  ;;  %v461_v8 = vpack.c.bf16 %v195_v7, %v194_v6  ;;  %v196_v9 = vld [vmem:[#allocation7 + $0x70] sm:$0xff]  ;;  %v197_v10 = vld [vmem:[#allocation7 + $0x78] sm:$0xff]  ;;  %v312_v14 = vld [vmem:[%s678_s2] ss:$0 sm:$0xff]  ;;  %s582_s2 = smov [#allocation8]  }
  0x49   :  { %v465_v11 = vpack.c.bf16 %v197_v10, %v196_v9  ;;  %v313_v23 = vld [vmem:[%s680_s4] ss:$0 sm:$0xff]  ;;  %s299_s11 = sshll.u32 %s582_s2, 4  ;;  %s300_s11 = int_to_ptr.vmem [resolvable:$true] %s299_s11 }
  0x4a   :  { %s547_s4 = scalar_lea.vmem %s300_s11, 256  ;;  %p552_p11 = scmp.lt.s32.totalorder %s300_s11, %s300_s11 }
  0x4b   :  { %424 = vmatpush3.bf16.msra.mxu0 %v423_v40  ;;  %448 = vmatpush3.bf16.msra.mxu1 %v445_v45  ;;  %p548_p10 = scmp.ne.s32.totalorder %s300_s11, %s547_s4  ;;  %p553_p12 = scmp.lt.s32.totalorder %s547_s4, %s547_s4 }
  0x4c   :  { %426 = vmatprep.subr.bf16.mxu0 %v425_v41  ;;  %450 = vmatprep.subr.bf16.mxu1 %v449_v54 }
  0x4d   :  { %p554_p13 = por %p553_p12, %p552_p11 }
  0x4f   :  { %428 = vmatpush3.bf16.msra.mxu0 %v427_v49  ;;  %452 = vmatpush3.bf16.msra.mxu1 %v449_v54  ;;  %p555_p0 = pnand %p554_p13, %p548_p10 }
  0x50   :  { %430 = vmatprep.subr.bf16.mxu0 %v429_v50  ;;  %454 = vmatprep.subr.bf16.mxu1 %v453_v62 }
  0x53   :  { %432 = vmatpush3.bf16.msra.mxu0 %v431_v58  ;;  %456 = vmatpush3.bf16.msra.mxu1 %v453_v62 }
  0x54   :  { %434 = vmatprep.subr.bf16.mxu0 %v433_v59  ;;  %458 = vmatprep.subr.bf16.mxu1 %v457_v5 }
  0x57   :  { %436 = vmatpush3.bf16.msra.mxu0 %v435_v63  ;;  %460 = vmatpush3.bf16.msra.mxu1 %v457_v5 }
  0x58   :  { %462 = vmatprep.subr.bf16.mxu1 %v461_v8 }
  0x5a   :  { %170 = vmatmul.mubr.f32.vlgmr.msra.gmra.mrb[0].mxu0 %v62_v0 }
  0x5b   :  { %174 = vmatprep.mubr.f32.mxu0 %v65_v1  ;;  %464 = vmatpush3.bf16.msra.mxu1 %v461_v8 }
  0x5c   :  { %466 = vmatprep.subr.bf16.mxu1 %v465_v11 }
  0x5e   :  { %175 = vmatmul.mubr.f32.gmra.mrb[2].mxu0 %v64_v2 }
  0x5f   :  { %468 = vmatpush3.bf16.msra.mxu1 %v465_v11 }
 0x12d   :  { %v346_v12 = vpop.f32.mrb[0].mxu0 }
 0x12e   :  { %v347_v13 = vpop.f32.mrb[1].mxu0 }
 0x12f   :  { %v348_v15 = vadd.f32 %v347_v13, %v346_v12 }
 0x131   :  { %v349_v16 = vpop.f32.mrb[2].mxu0  ;;  %v172_v17 = vadd.f32 %v348_v15, %v312_v14 }
 0x132   :  { %v350_v18 = vpop.f32.mrb[3].mxu0 }
 0x133   :  { %v351_v19 = vadd.f32 %v350_v18, %v349_v16  ;;  %v180_v20 = vmax.f32 %v172_v17, 0.0 }
 0x135   :  { %v177_v21 = vadd.f32 %v351_v19, %v312_v14  ;;  %402 = vmatprep.mubr.f32.mxu1 %v180_v20 }
 0x137   :  { %v181_v22 = vmax.f32 %v177_v21, 0.0 }
 0x139   :  { %403 = vmatmul.mubr.f32.vlgmr.msra.gmra.mrb[0].mxu1 %v181_v22 }
 0x20c   :  { %v404_v24 = vpop.f32.mrb[0].mxu1 }
 0x20d   :  { %v271_v25 = vpop.f32.mrb[1].mxu1  ;;  %v277_v27 = vadd.f32 %v404_v24, %v313_v23 }
 0x20e   :  { %v272_v26 = vadd.f32 %v313_v23, %v271_v25 }
 0x20f   :  { %v281_v29 = vmul.f32 %v277_v27, %v277_v27 }
 0x210   :  { %v280_v28 = vmul.f32 %v272_v26, %v272_v26 }
 0x212   :  { %282 = vadd.xlane.f32.xlu0 %v280_v28 }
 0x216   :  { %284 = vadd.xlane.f32.xlu0 %v281_v29 }
 0x29f   :  { %v283_v30 = vpop.xlane.xlu0 %282 }
 0x2a0   :  { %v286_v31 = vmax.f32 %v283_v30, 1e-24 }
 0x2a2   :  { %477 = vrsqrt.f32 %v286_v31 }
 0x2a3   :  { %v285_v32 = vpop.xlane.xlu0 %284 }
 0x2a4   :  { %v287_v33 = vmax.f32 %v285_v32, 1e-24 }
 0x2a6   :  { %479 = vrsqrt.f32 %v287_v33 }
 0x2ac   :  { %v478_v34 = vpop.eup %477 }
 0x2ad   :  { %v290_v35 = vmul.f32 %v478_v34, %v272_v26 }
 0x2af   :  { %292 = vst [vmem:[#allocation8] sm:$0xff] %v290_v35 }
 0x2b0   :  { %v480_v36 = vpop.eup %479 }
 0x2b1   :  { %v291_v37 = vmul.f32 %v480_v36, %v277_v27 }
 0x2b3   :  { %293 = vst [vmem:[#allocation8 + $0x8] sm:$0xff] %v291_v37 }
 0x2b4   :  { %558 = shalt.err (!%p555_p0)
}
 0x2b5   :  { %s559_s14 = scalar_lea.hbm %s681_s5, 256 }
 0x2b6   :  { %p560_p1 = scmp.ne.s32.totalorder %s681_s5, %s559_s14  ;;  %p563_p2 = scmp.lt.u32.totalorder %s559_s14, %s681_s5 }
 0x2b8   :  { %p565_p3 = pnand %p563_p2, %p560_p1 }
 0x2ba   :  { %568 = shalt.err (!%p565_p3)
}
 0x2bb   :  { %305 = dma.vmem_to_hbm [thread:$0]  %s300_s11, 256, %s681_s5, [#allocation4], %s576_s28, %s576_s28, %s577_s29  }
 0x2bc   :  { %573 = dma.done.wait [#allocation4], 256  }
 0x2bd   :  { %574 = vsyncadd [#allocation4], 4294967040 }
 0x2be   :  { %309 = vsyncpa [#allocation3], 1 }
 0x2bf   :  { %310 = vsyncpa [#allocation6], 1 }
 0x2c0   :  { %311 = vsyncpa [#allocation4], 1 }

</bundles_post_ra>
